<compile_context>
chip_gen: v5e
topology: v5e:2x2
jax: 0.10.0
libtpu: 0.0.40
codegen_flags: <defaults>
</compile_context>

<pallas_src>
import jax
import jax.numpy as jnp
from jax.experimental import pallas as pl
from jax.experimental.pallas import tpu as pltpu


def _silu(x):
    return x * jax.nn.sigmoid(x)


def _round_up(n, m):
    return ((n + m - 1) // m) * m


def invgamma_kernel(
    x_ref, stocks_ref,
    w1_ref, b1_ref,
    w2a_ref, b2_ref, emb_tab_ref,
    w3_ref, b3_ref,
    wh_ref, bh_ref,
    out_ref,
):
    # linear1 : (TB, nf) @ (nf, 128), f32 accumulation on the MXU
    h1 = jnp.dot(x_ref[...], w1_ref[...],
                 preferred_element_type=jnp.float32) + b1_ref[...]
    a1 = _silu(h1)                                     # f32 (VPU + EUP)

    # Embedding branch: gather precomputed SiLU(emb) @ W2b rows via an exact
    # one-hot matmul (stocks indices are the only per-row embedding input).
    stocks = stocks_ref[...]                           # (TB, 1) int32
    tam = emb_tab_ref.shape[0]
    lane = jax.lax.broadcasted_iota(jnp.int32, (stocks.shape[0], tam), 1)
    onehot = (lane == stocks).astype(jnp.float32)      # (TB, tam), exact 0/1
    emb_h2 = jnp.dot(onehot, emb_tab_ref[...],
                     preferred_element_type=jnp.float32)   # (TB, 64)

    # linear2 : SiLU(concat(h1, emb)) @ W2 == SiLU(h1)@W2a + SiLU(emb)@W2b
    h2 = (jnp.dot(a1.astype(w2a_ref.dtype), w2a_ref[...],
                  preferred_element_type=jnp.float32)
          + emb_h2 + b2_ref[...])
    a2 = _silu(h2)

    # linear3
    h3 = jnp.dot(a2.astype(w3_ref.dtype), w3_ref[...],
                 preferred_element_type=jnp.float32) + b3_ref[...]
    a3 = _silu(h3)

    # Fused InvGamma heads: one (32, 2) matmul instead of two (32, 1) matmuls.
    head = jnp.dot(a3.astype(wh_ref.dtype), wh_ref[...],
                   preferred_element_type=jnp.float32) + bh_ref[...]
    sp = jax.nn.softplus(head)                         # f32 for stability
    col = jax.lax.broadcasted_iota(jnp.int32, sp.shape, 1)
    out_ref[...] = sp + jnp.where(col == 0, 1.0, 0.0)  # alpha column gets +1


def invgamma_forward(x, stocks, params, *, tile_b=512, mxu_dtype=jnp.bfloat16):
    """x: (B, n_features) f32, stocks: (B,) int -> (B, 2) f32 [alpha, beta]."""
    B, n_features = x.shape
    tam, _ = params["embedding"].shape

    # Derived / fused parameters (tiny; XLA hoists these when the caller jits).
    emb_tab = _silu(params["embedding"]) @ params["w2b"]            # (tam, 64) f32
    w_head = jnp.concatenate([params["wa"], params["wb"]], axis=1)  # (32, 2)
    b_head = jnp.concatenate([params["ba"], params["bb"]], axis=1)  # (1, 2)

    w1 = params["w1"].astype(mxu_dtype)
    w2a = params["w2a"].astype(mxu_dtype)
    w3 = params["w3"].astype(mxu_dtype)
    w_head = w_head.astype(mxu_dtype)
    b1, b2, b3 = params["b1"], params["b2"], params["b3"]

    # Batch tiling: large sublane-dense tiles; pad + slice for ragged batches.
    tile_b = max(8, min(int(tile_b), _round_up(B, 8)))
    B_pad = _round_up(B, tile_b)
    x_p = jnp.zeros((B_pad, n_features), mxu_dtype).at[:B].set(x.astype(mxu_dtype))
    s_p = jnp.zeros((B_pad, 1), jnp.int32).at[:B, 0].set(stocks.astype(jnp.int32))

    def full(a):
        return pl.BlockSpec(a.shape, lambda i: (0,) * a.ndim)

    itemsize = jnp.dtype(mxu_dtype).itemsize
    weight_bytes = sum(int(a.size) * a.dtype.itemsize for a in
                       (w1, b1, w2a, b2, emb_tab, w3, b3, w_head, b_head))
    cost = pl.CostEstimate(
        flops=int(2 * B_pad * (n_features * 128 + 128 * 64 + tam * 64
                               + 64 * 32 + 32 * 2)),
        transcendentals=int(B_pad * (128 + 64 + 32 + 2)),
        bytes_accessed=int(B_pad * (n_features * itemsize + 4 + 2 * 4)
                           + weight_bytes),
    )

    out = pl.pallas_call(
        invgamma_kernel,
        out_shape=jax.ShapeDtypeStruct((B_pad, 2), jnp.float32),
        grid_spec=pltpu.PrefetchScalarGridSpec(
            num_scalar_prefetch=0,
            grid=(B_pad // tile_b,),
            in_specs=[
                pl.BlockSpec((tile_b, n_features), lambda i: (i, 0)),
                pl.BlockSpec((tile_b, 1), lambda i: (i, 0)),
                full(w1), full(b1),
                full(w2a), full(b2), full(emb_tab),
                full(w3), full(b3),
                full(w_head), full(b_head),
            ],
            out_specs=pl.BlockSpec((tile_b, 2), lambda i: (i, 0)),
        ),
        compiler_params=pltpu.CompilerParams(
            dimension_semantics=("parallel",),
        ),
        cost_estimate=cost,
    )(x_p, s_p, w1, b1, w2a, b2, emb_tab, w3, b3, w_head, b_head)
    return out[:B]


def init_params(key, n_features, tam, stock_emb_dim=20):
    """Deterministic synthetic parameters matching the PyTorch module shapes."""
    ks = jax.random.split(key, 12)

    def lin(kw, kb, fan_in, fan_out):
        bound = 1.0 / jnp.sqrt(fan_in)
        w = jax.random.uniform(kw, (fan_in, fan_out), jnp.float32, -bound, bound)
        b = jax.random.uniform(kb, (1, fan_out), jnp.float32, -bound, bound)
        return w, b

    w1, b1 = lin(ks[0], ks[1], n_features, 128)
    w2, b2 = lin(ks[2], ks[3], 128 + stock_emb_dim, 64)
    w3, b3 = lin(ks[4], ks[5], 64, 32)
    wa, ba = lin(ks[6], ks[7], 32, 1)
    wb, bb = lin(ks[8], ks[9], 32, 1)
    embedding = jax.random.normal(ks[10], (tam, stock_emb_dim), jnp.float32)

    return {
        "embedding": embedding,
        "w1": w1, "b1": b1,
        # W2 pre-split along its input dim to match concat([h1, emb]).
        "w2a": w2[:128, :], "w2b": w2[128:, :], "b2": b2,
        "w3": w3, "b3": b3,
        "wa": wa, "ba": ba,
        "wb": wb, "bb": bb,
    }


def reference_forward(x, stocks, params):
    """Pure-JAX f32 reference for correctness checking."""
    emb = params["embedding"][stocks]
    h1 = x @ params["w1"] + params["b1"]
    merged = jnp.concatenate([h1, emb], axis=1)
    a1 = _silu(merged)
    w2 = jnp.concatenate([params["w2a"], params["w2b"]], axis=0)
    a2 = _silu(a1 @ w2 + params["b2"])
    a3 = _silu(a2 @ params["w3"] + params["b3"])
    alpha = jax.nn.softplus(a3 @ params["wa"] + params["ba"]) + 1.0
    beta = jax.nn.softplus(a3 @ params["wb"] + params["bb"])
    return jnp.concatenate([alpha, beta], axis=1)


if __name__ == "__main__":
    key = jax.random.PRNGKey(0)
    k_params, k_x, k_s = jax.random.split(key, 3)

    n_features = 32
    tam = 10            # number of distinct stocks (embedding rows)
    stock_emb_dim = 20
    B = 16

    params = init_params(k_params, n_features, tam, stock_emb_dim)
    x = jax.random.normal(k_x, (B, n_features), jnp.float32)
    stocks = jax.random.randint(k_s, (B,), 0, tam, jnp.int32)

    ref = reference_forward(x, stocks, params)

    # f32 MXU operands: exact-path check vs. pure-JAX reference.
    out_f32 = jax.block_until_ready(
        invgamma_forward(x, stocks, params, tile_b=512, mxu_dtype=jnp.float32))
    assert out_f32.shape == (B, 2)
    assert jnp.allclose(out_f32, ref, atol=1e-5, rtol=1e-5), (
        f"f32 max abs err {jnp.max(jnp.abs(out_f32 - ref))}"
    )

    # bf16 MXU operands (default fast path on v6e/v7x): looser tolerance.
    out_bf16 = jax.block_until_ready(
        invgamma_forward(x, stocks, params, tile_b=512))
    assert out_bf16.shape == (B, 2)
    assert jnp.allclose(out_bf16, ref, atol=5e-2, rtol=5e-2), (
        f"bf16 max abs err {jnp.max(jnp.abs(out_bf16 - ref))}"
    )

    # Ragged batch exercises the pad-and-slice path.
    out_r = jax.block_until_ready(
        invgamma_forward(x[:13], stocks[:13], params, mxu_dtype=jnp.float32))
    assert jnp.allclose(out_r, ref[:13], atol=1e-5, rtol=1e-5), (
        f"ragged max abs err {jnp.max(jnp.abs(out_r - ref[:13]))}"
    )

    print("KERNEL_OK")
</pallas_src>

<mosaic_0001>
module attributes {stable_mosaic.version = 11 : i64} {
  func.func @invgamma_kernel(%arg0: i32, %arg1: memref<16x32xf32, #tpu.memory_space<vmem>>, %arg2: memref<16x1xi32, #tpu.memory_space<vmem>>, %arg3: memref<32x128xf32, #tpu.memory_space<vmem>>, %arg4: memref<1x128xf32, #tpu.memory_space<vmem>>, %arg5: memref<128x64xf32, #tpu.memory_space<vmem>>, %arg6: memref<1x64xf32, #tpu.memory_space<vmem>>, %arg7: memref<10x64xf32, #tpu.memory_space<vmem>>, %arg8: memref<64x32xf32, #tpu.memory_space<vmem>>, %arg9: memref<1x32xf32, #tpu.memory_space<vmem>>, %arg10: memref<32x2xf32, #tpu.memory_space<vmem>>, %arg11: memref<1x2xf32, #tpu.memory_space<vmem>>, %arg12: memref<16x2xf32, #tpu.memory_space<vmem>>) attributes {dimension_semantics = [#tpu.dimension_semantics<parallel>], iteration_bounds = array<i64: 1>, scalar_prefetch = 0 : i64, scratch_operands = 0 : i64, tpu.core_type = #tpu.core_type<tc>, window_params = [{transform_indices = @transform_0, window_bounds = array<i64: 16, 32>}, {transform_indices = @transform_1, window_bounds = array<i64: 16, 1>}, {pipeline_mode = #tpu.pipeline_mode<synchronous>, transform_indices = @transform_2, window_bounds = array<i64: 32, 128>}, {pipeline_mode = #tpu.pipeline_mode<synchronous>, transform_indices = @transform_3, window_bounds = array<i64: 1, 128>}, {pipeline_mode = #tpu.pipeline_mode<synchronous>, transform_indices = @transform_4, window_bounds = array<i64: 128, 64>}, {pipeline_mode = #tpu.pipeline_mode<synchronous>, transform_indices = @transform_5, window_bounds = array<i64: 1, 64>}, {pipeline_mode = #tpu.pipeline_mode<synchronous>, transform_indices = @transform_6, window_bounds = array<i64: 10, 64>}, {pipeline_mode = #tpu.pipeline_mode<synchronous>, transform_indices = @transform_7, window_bounds = array<i64: 64, 32>}, {pipeline_mode = #tpu.pipeline_mode<synchronous>, transform_indices = @transform_8, window_bounds = array<i64: 1, 32>}, {pipeline_mode = #tpu.pipeline_mode<synchronous>, transform_indices = @transform_9, window_bounds = array<i64: 32, 2>}, {pipeline_mode = #tpu.pipeline_mode<synchronous>, transform_indices = @transform_10, window_bounds = array<i64: 1, 2>}, {transform_indices = @transform_11, window_bounds = array<i64: 16, 2>}]} {
    %c0 = arith.constant 0 : index
    %c0_0 = arith.constant 0 : index
    %0 = vector.load %arg1[%c0, %c0_0] : memref<16x32xf32, #tpu.memory_space<vmem>>, vector<16x32xf32>
    %c0_1 = arith.constant 0 : index
    %c0_2 = arith.constant 0 : index
    %1 = vector.load %arg3[%c0_1, %c0_2] : memref<32x128xf32, #tpu.memory_space<vmem>>, vector<32x128xf32>
    %cst = arith.constant dense<0.000000e+00> : vector<16x128xf32>
    %2 = tpu.matmul %0, %1, %cst {dimension_numbers = #tpu.dot_dimension_numbers<[1], [0], [0], [1], [0, 0, 1, 1], [], []>} : vector<16x32xf32>, vector<32x128xf32>, vector<16x128xf32> -> vector<16x128xf32>
    %c0_3 = arith.constant 0 : index
    %c0_4 = arith.constant 0 : index
    %3 = vector.load %arg4[%c0_3, %c0_4] : memref<1x128xf32, #tpu.memory_space<vmem>>, vector<1x128xf32>
    %4 = vector.broadcast %3 : vector<1x128xf32> to vector<16x128xf32>
    %5 = arith.addf %2, %4 : vector<16x128xf32>
    %6 = arith.negf %5 : vector<16x128xf32>
    %7 = math.exp %6 : vector<16x128xf32>
    %cst_5 = arith.constant 1.000000e+00 : f32
    %8 = vector.broadcast %cst_5 : f32 to vector<16x128xf32>
    %9 = arith.addf %8, %7 : vector<16x128xf32>
    %10 = arith.divf %8, %9 : vector<16x128xf32>
    %11 = arith.mulf %5, %10 : vector<16x128xf32>
    %c0_6 = arith.constant 0 : index
    %c0_7 = arith.constant 0 : index
    %12 = vector.load %arg2[%c0_6, %c0_7] : memref<16x1xi32, #tpu.memory_space<vmem>>, vector<16x1xi32>
    %13 = tpu.iota {dimensions = array<i32: 1>} : vector<16x10xi32>
    %14 = vector.broadcast %12 : vector<16x1xi32> to vector<16x10xi32>
    %15 = arith.cmpi eq, %13, %14 : vector<16x10xi32>
    %16 = arith.extui %15 : vector<16x10xi1> to vector<16x10xi32>
    %17 = arith.sitofp %16 : vector<16x10xi32> to vector<16x10xf32>
    %c0_8 = arith.constant 0 : index
    %c0_9 = arith.constant 0 : index
    %18 = vector.load %arg7[%c0_8, %c0_9] : memref<10x64xf32, #tpu.memory_space<vmem>>, vector<10x64xf32>
    %cst_10 = arith.constant dense<0.000000e+00> : vector<16x64xf32>
    %19 = tpu.matmul %17, %18, %cst_10 {dimension_numbers = #tpu.dot_dimension_numbers<[1], [0], [0], [1], [0, 0, 1, 1], [], []>} : vector<16x10xf32>, vector<10x64xf32>, vector<16x64xf32> -> vector<16x64xf32>
    %c0_11 = arith.constant 0 : index
    %c0_12 = arith.constant 0 : index
    %20 = vector.load %arg5[%c0_11, %c0_12] : memref<128x64xf32, #tpu.memory_space<vmem>>, vector<128x64xf32>
    %cst_13 = arith.constant dense<0.000000e+00> : vector<16x64xf32>
    %21 = tpu.matmul %11, %20, %cst_13 {dimension_numbers = #tpu.dot_dimension_numbers<[1], [0], [0], [1], [0, 0, 1, 1], [], []>} : vector<16x128xf32>, vector<128x64xf32>, vector<16x64xf32> -> vector<16x64xf32>
    %22 = arith.addf %21, %19 : vector<16x64xf32>
    %c0_14 = arith.constant 0 : index
    %c0_15 = arith.constant 0 : index
    %23 = vector.load %arg6[%c0_14, %c0_15] : memref<1x64xf32, #tpu.memory_space<vmem>>, vector<1x64xf32>
    %24 = vector.broadcast %23 : vector<1x64xf32> to vector<16x64xf32>
    %25 = arith.addf %22, %24 : vector<16x64xf32>
    %26 = arith.negf %25 : vector<16x64xf32>
    %27 = math.exp %26 : vector<16x64xf32>
    %cst_16 = arith.constant 1.000000e+00 : f32
    %28 = vector.broadcast %cst_16 : f32 to vector<16x64xf32>
    %29 = arith.addf %28, %27 : vector<16x64xf32>
    %30 = arith.divf %28, %29 : vector<16x64xf32>
    %31 = arith.mulf %25, %30 : vector<16x64xf32>
    %c0_17 = arith.constant 0 : index
    %c0_18 = arith.constant 0 : index
    %32 = vector.load %arg8[%c0_17, %c0_18] : memref<64x32xf32, #tpu.memory_space<vmem>>, vector<64x32xf32>
    %cst_19 = arith.constant dense<0.000000e+00> : vector<16x32xf32>
    %33 = tpu.matmul %31, %32, %cst_19 {dimension_numbers = #tpu.dot_dimension_numbers<[1], [0], [0], [1], [0, 0, 1, 1], [], []>} : vector<16x64xf32>, vector<64x32xf32>, vector<16x32xf32> -> vector<16x32xf32>
    %c0_20 = arith.constant 0 : index
    %c0_21 = arith.constant 0 : index
    %34 = vector.load %arg9[%c0_20, %c0_21] : memref<1x32xf32, #tpu.memory_space<vmem>>, vector<1x32xf32>
    %35 = vector.broadcast %34 : vector<1x32xf32> to vector<16x32xf32>
    %36 = arith.addf %33, %35 : vector<16x32xf32>
    %37 = arith.negf %36 : vector<16x32xf32>
    %38 = math.exp %37 : vector<16x32xf32>
    %cst_22 = arith.constant 1.000000e+00 : f32
    %39 = vector.broadcast %cst_22 : f32 to vector<16x32xf32>
    %40 = arith.addf %39, %38 : vector<16x32xf32>
    %41 = arith.divf %39, %40 : vector<16x32xf32>
    %42 = arith.mulf %36, %41 : vector<16x32xf32>
    %c0_23 = arith.constant 0 : index
    %c0_24 = arith.constant 0 : index
    %43 = vector.load %arg10[%c0_23, %c0_24] : memref<32x2xf32, #tpu.memory_space<vmem>>, vector<32x2xf32>
    %cst_25 = arith.constant dense<0.000000e+00> : vector<16x2xf32>
    %44 = tpu.matmul %42, %43, %cst_25 {dimension_numbers = #tpu.dot_dimension_numbers<[1], [0], [0], [1], [0, 0, 1, 1], [], []>} : vector<16x32xf32>, vector<32x2xf32>, vector<16x2xf32> -> vector<16x2xf32>
    %c0_26 = arith.constant 0 : index
    %c0_27 = arith.constant 0 : index
    %45 = vector.load %arg11[%c0_26, %c0_27] : memref<1x2xf32, #tpu.memory_space<vmem>>, vector<1x2xf32>
    %46 = vector.broadcast %45 : vector<1x2xf32> to vector<16x2xf32>
    %47 = arith.addf %44, %46 : vector<16x2xf32>
    %cst_28 = arith.constant 0.000000e+00 : f32
    %48 = vector.broadcast %cst_28 : f32 to vector<16x2xf32>
    %49 = arith.maximumf %47, %48 : vector<16x2xf32>
    %50 = vector.broadcast %cst_28 : f32 to vector<16x2xf32>
    %51 = arith.subf %47, %50 : vector<16x2xf32>
    %52 = arith.cmpf one, %51, %51 : vector<16x2xf32>
    %53 = vector.broadcast %cst_28 : f32 to vector<16x2xf32>
    %54 = arith.addf %47, %53 : vector<16x2xf32>
    %55 = math.absf %51 : vector<16x2xf32>
    %cst_29 = arith.constant 0.000000e+00 : f32
    %56 = vector.broadcast %cst_29 : f32 to vector<16x2xf32>
    %57 = arith.subf %56, %55 : vector<16x2xf32>
    %58 = math.exp %57 : vector<16x2xf32>
    %59 = math.log1p %58 : vector<16x2xf32>
    %60 = arith.addf %49, %59 : vector<16x2xf32>
    %61 = arith.select %52, %54, %60 : vector<16x2xi1>, vector<16x2xf32>
    %62 = tpu.iota {dimensions = array<i32: 1>} : vector<16x2xi32>
    %c0_i32 = arith.constant 0 : i32
    %63 = vector.broadcast %c0_i32 : i32 to vector<16x2xi32>
    %64 = arith.cmpi eq, %62, %63 : vector<16x2xi32>
    %cst_30 = arith.constant 1.000000e+00 : f32
    %cst_31 = arith.constant 0.000000e+00 : f32
    %65 = vector.broadcast %cst_30 : f32 to vector<16x2xf32>
    %66 = vector.broadcast %cst_31 : f32 to vector<16x2xf32>
    %67 = arith.select %64, %65, %66 : vector<16x2xi1>, vector<16x2xf32>
    %68 = arith.addf %61, %67 : vector<16x2xf32>
    %c0_32 = arith.constant 0 : index
    %c0_33 = arith.constant 0 : index
    %69 = vector.load %arg12[%c0_32, %c0_33] : memref<16x2xf32, #tpu.memory_space<vmem>>, vector<16x2xf32>
    tpu.vector_store %arg12[%c0_32, %c0_33], %68 {strides = array<i32>} : memref<16x2xf32, #tpu.memory_space<vmem>>, vector<16x2xf32>,
    return
  }
  func.func @transform_0(%arg0: i32) -> (i32, i32) {
    %c0_i32 = arith.constant 0 : i32
    %c0_i32_0 = arith.constant 0 : i32
    return %arg0, %c0_i32 : i32, i32
  }
  func.func @transform_1(%arg0: i32) -> (i32, i32) {
    %c0_i32 = arith.constant 0 : i32
    %c0_i32_0 = arith.constant 0 : i32
    return %arg0, %c0_i32 : i32, i32
  }
  func.func @transform_2(%arg0: i32) -> (i32, i32) {
    %c0_i32 = arith.constant 0 : i32
    %c0_i32_0 = arith.constant 0 : i32
    %c0_i32_1 = arith.constant 0 : i32
    return %c0_i32, %c0_i32_0 : i32, i32
  }
  func.func @transform_3(%arg0: i32) -> (i32, i32) {
    %c0_i32 = arith.constant 0 : i32
    %c0_i32_0 = arith.constant 0 : i32
    %c0_i32_1 = arith.constant 0 : i32
    return %c0_i32, %c0_i32_0 : i32, i32
  }
  func.func @transform_4(%arg0: i32) -> (i32, i32) {
    %c0_i32 = arith.constant 0 : i32
    %c0_i32_0 = arith.constant 0 : i32
    %c0_i32_1 = arith.constant 0 : i32
    return %c0_i32, %c0_i32_0 : i32, i32
  }
  func.func @transform_5(%arg0: i32) -> (i32, i32) {
    %c0_i32 = arith.constant 0 : i32
    %c0_i32_0 = arith.constant 0 : i32
    %c0_i32_1 = arith.constant 0 : i32
    return %c0_i32, %c0_i32_0 : i32, i32
  }
  func.func @transform_6(%arg0: i32) -> (i32, i32) {
    %c0_i32 = arith.constant 0 : i32
    %c0_i32_0 = arith.constant 0 : i32
    %c0_i32_1 = arith.constant 0 : i32
    return %c0_i32, %c0_i32_0 : i32, i32
  }
  func.func @transform_7(%arg0: i32) -> (i32, i32) {
    %c0_i32 = arith.constant 0 : i32
    %c0_i32_0 = arith.constant 0 : i32
    %c0_i32_1 = arith.constant 0 : i32
    return %c0_i32, %c0_i32_0 : i32, i32
  }
  func.func @transform_8(%arg0: i32) -> (i32, i32) {
    %c0_i32 = arith.constant 0 : i32
    %c0_i32_0 = arith.constant 0 : i32
    %c0_i32_1 = arith.constant 0 : i32
    return %c0_i32, %c0_i32_0 : i32, i32
  }
  func.func @transform_9(%arg0: i32) -> (i32, i32) {
    %c0_i32 = arith.constant 0 : i32
    %c0_i32_0 = arith.constant 0 : i32
    %c0_i32_1 = arith.constant 0 : i32
    return %c0_i32, %c0_i32_0 : i32, i32
  }
  func.func @transform_10(%arg0: i32) -> (i32, i32) {
    %c0_i32 = arith.constant 0 : i32
    %c0_i32_0 = arith.constant 0 : i32
    %c0_i32_1 = arith.constant 0 : i32
    return %c0_i32, %c0_i32_0 : i32, i32
  }
  func.func @transform_11(%arg0: i32) -> (i32, i32) {
    %c0_i32 = arith.constant 0 : i32
    %c0_i32_0 = arith.constant 0 : i32
    return %arg0, %c0_i32 : i32, i32
  }
}

</mosaic_0001>

<bundles_post_ra>
// kernel: tpu_custom_call.1
= control target key start
LH: loop header
LB: loop body
LE: loop exit
PB: predicated region body
PF: predicated region fallthrough
CT: control target
= control target key end

     0   :  { %v477_v2 = vmov 0   ;;  %vm48_vm0 = vcmask 261120   ;;  %vm143_vm1 = vcmask 1041408   ;;  %v120_v22 = vlaneseq  ;;  %s683_s2 = inlined_call_operand.vmem [shape: f32[32,128], index: 2, kind: input, shape index: {}]   ;;  %s684_s1 = inlined_call_operand.vmem [shape: s32[16,1], index: 1, kind: input, shape index: {}]   ;;  %s685_s3 = inlined_call_operand.vmem [shape: f32[1,128], index: 3, kind: input, shape index: {}]   ;;  %s686_s0 = inlined_call_operand.vmem [shape: f32[16,32], index: 0, kind: input, shape index: {}]   ;;  %s687_s4 = inlined_call_operand.vmem [shape: f32[128,64], index: 4, kind: input, shape index: {}]   ;;  %s688_s6 = inlined_call_operand.vmem [shape: f32[10,64], index: 6, kind: input, shape index: {}]   ;;  %s689_s5 = inlined_call_operand.vmem [shape: f32[1,64], index: 5, kind: input, shape index: {}]   ;;  %s690_s8 = inlined_call_operand.vmem [shape: f32[1,32], index: 8, kind: input, shape index: {}]   ;;  %s691_s7 = inlined_call_operand.vmem [shape: f32[64,32], index: 7, kind: input, shape index: {}]   ;;  %s692_s10 = inlined_call_operand.vmem [shape: f32[1,2], index: 10, kind: input, shape index: {}]   ;;  %s693_s9 = inlined_call_operand.vmem [shape: f32[32,2], index: 9, kind: input, shape index: {}]   ;;  %s694_s11 = inlined_call_operand.vmem [shape: f32[16,2], index: 11, kind: output, shape index: {}]  }
   0x1   :  { %v43_v0 = vld [vmem:[%s683_s2 + $0x18] sm:$0xff]  ;;  %v42_v1 = vld [vmem:[%s683_s2 + $0x10] sm:$0xff]  ;;  %440 = vset.pattern.permute.xlu0 %v477_v2  ;;  %v41_v3 = vld [vmem:[%s683_s2 + $0x8] sm:$0xff]  ;;  %vm136_vm2 = vcmask 80896   ;;  %v478_v28 = vmov 0.0  }
   0x2   :  { %67 = vmatpush.msra.mxu0 %v43_v0  ;;  %v118_v4 = vld [vmem:[%s684_s1] sm:$0xff]  ;;  %v119_v7 = vld [vmem:[%s684_s1 + $0x8] sm:$0xff]  ;;  %v185_v9 = vld [vmem:[%s687_s4 + $0x78] sm:$0xff]  ;;  %v121_v26 = vand.u32 127, %v120_v22 }
   0x3   :  { %123 = vperm.xlu0 %440, %v118_v4   ;;  %v40_v5 = vld [vmem:[%s683_s2] sm:$0xff]  ;;  %v39_v8 = vld [vmem:[%s686_s0 + $0x8] sm:$0xff]  ;;  %186 = vmatpush.msra.mxu2 %v185_v9  ;;  %v184_v10 = vld [vmem:[%s687_s4 + $0x70] sm:$0xff] }
   0x4   :  { %68 = vmatpush.msra.mxu0 %v42_v1  ;;  %v38_v6 = vld [vmem:[%s686_s0] sm:$0xff]  ;;  %v183_v11 = vld [vmem:[%s687_s4 + $0x68] sm:$0xff]  ;;  %v181_v13 = vld [vmem:[%s687_s4 + $0x58] sm:$0xff]  ;;  %vm410_vm3 = vcmp.eq.s32.totalorder %v121_v26, 0 }
   0x5   :  { %187 = vmatpush.msra.mxu2 %v184_v10  ;;  %v182_v12 = vld [vmem:[%s687_s4 + $0x60] sm:$0xff]  ;;  %v180_v14 = vld [vmem:[%s687_s4 + $0x50] sm:$0xff]  ;;  %v179_v15 = vld [vmem:[%s687_s4 + $0x48] sm:$0xff]  ;;  %v613_v29 = vsel %vm410_vm3, 1.0, %v478_v28  ;;  %vm267_vm3 = vcmask 523264  }
   0x6   :  { %69 = vmatpush.msra.mxu0 %v41_v3  ;;  %v178_v16 = vld [vmem:[%s687_s4 + $0x40] sm:$0xff]  ;;  %v177_v17 = vld [vmem:[%s687_s4 + $0x38] sm:$0xff]  ;;  %v176_v18 = vld [vmem:[%s687_s4 + $0x30] sm:$0xff] }
   0x7   :  { %188 = vmatpush.msra.mxu2 %v183_v11  ;;  %v175_v19 = vld [vmem:[%s687_s4 + $0x28] sm:$0xff]  ;;  %v174_v20 = vld [vmem:[%s687_s4 + $0x20] sm:$0xff]  ;;  %v173_v23 = vld [vmem:[%s687_s4 + $0x18] sm:$0xff] }
   0x8   :  { %70 = vmatpush.msra.mxu0 %v40_v5  ;;  %v135_v21 = vld [vmem:[%s688_s6 + $0x8] sm:$0x3]  ;;  %v134_v25 = vld [vmem:[%s688_s6] sm:$0xff]  ;;  %v172_v27 = vld [vmem:[%s687_s4 + $0x10] sm:$0xff] }
   0x9   :  { %421 = vmatmul.msk.f32.vlgmr.msra.gmra.mxu0 %vm48_vm0, %v38_v6  ;;  %189 = vmatpush.msra.mxu2 %v182_v12  ;;  %v171_v31 = vld [vmem:[%s687_s4 + $0x8] sm:$0xff]  ;;  %v441_v32 = vld [vmem:[%s685_s3] ss:$0 sm:$0xff]  ;;  %v262_v4 = vld [vmem:[%s691_s7 + $0x38] sm:$0xff] }
   0xa   :  { %427 = vmatpush.msk.msra.mxu1 %vm143_vm1, %v135_v21  ;;  %v170_v33 = vld [vmem:[%s687_s4] sm:$0xff]  ;;  %282 = vmatpush.msra.mxu3 %v262_v4  ;;  %v261_v5 = vld [vmem:[%s691_s7 + $0x30] sm:$0xff]  ;;  %v260_v6 = vld [vmem:[%s691_s7 + $0x28] sm:$0xff] }
   0xb   :  { %126 = vperm.xlu0 %440, %v119_v7   ;;  %190 = vmatpush.msra.mxu2 %v181_v13  ;;  %v259_v7 = vld [vmem:[%s691_s7 + $0x20] sm:$0xff]  ;;  %v257_v9 = vld [vmem:[%s691_s7 + $0x10] sm:$0xff]  ;;  %v256_v10 = vld [vmem:[%s691_s7 + $0x8] sm:$0xff] }
   0xc   :  { %162 = vmatpush.msra.mxu1 %v134_v25  ;;  %283 = vmatpush.msra.mxu3 %v261_v5  ;;  %v442_v12 = vld [vmem:[%s689_s5] ss:$0 sm:$0xff] }
   0xd   :  { %191 = vmatpush.msra.mxu2 %v180_v14  ;;  %v255_v13 = vld [vmem:[%s691_s7] sm:$0xff] }
   0xe   :  { %284 = vmatpush.msra.mxu3 %v260_v6 }
   0xf   :  { %192 = vmatpush.msra.mxu2 %v179_v15 }
  0x10   :  { %285 = vmatpush.msra.mxu3 %v259_v7 }
  0x11   :  { %422 = vmatmul.msk.f32.gmra.mxu0 %vm48_vm0, %v39_v8  ;;  %193 = vmatpush.msra.mxu2 %v178_v16  ;;  %v258_v8 = vld [vmem:[%s691_s7 + $0x18] sm:$0xff] }
  0x12   :  { %286 = vmatpush.msra.mxu3 %v258_v8 }
  0x13   :  { %194 = vmatpush.msra.mxu2 %v177_v17 }
  0x14   :  { %287 = vmatpush.msra.mxu3 %v257_v9 }
  0x15   :  { %195 = vmatpush.msra.mxu2 %v176_v18 }
  0x16   :  { %288 = vmatpush.msra.mxu3 %v256_v10 }
  0x17   :  { %196 = vmatpush.msra.mxu2 %v175_v19 }
  0x18   :  { %289 = vmatpush.msra.mxu3 %v255_v13 }
  0x19   :  { %197 = vmatpush.msra.mxu2 %v174_v20 }
  0x1b   :  { %198 = vmatpush.msra.mxu2 %v173_v23 }
  0x1d   :  { %199 = vmatpush.msra.mxu2 %v172_v27 }
  0x1f   :  { %200 = vmatpush.msra.mxu2 %v171_v31 }
  0x21   :  { %201 = vmatpush.msra.mxu2 %v170_v33 }
  0x75   :  { %v124_v24 = vpop.permute.xlu0 %123 }
  0x76   :  { %vm128_vm4 = vcmp.eq.s32.totalorder %v121_v26, %v124_v24 }
  0x77   :  { %v425_v30 = vsel %vm128_vm4, 1.0, %v478_v28 }
  0x78   :  { %428 = vmatmul.msk.f32.vlgmr.msra.gmra.mxu1 %vm136_vm2, %v425_v30 }
  0x7d   :  { %v127_v36 = vpop.permute.xlu0 %126 }
  0x7e   :  { %vm129_vm5 = vcmp.eq.s32.totalorder %v121_v26, %v127_v36 }
  0x7f   :  { %v426_v38 = vsel %vm129_vm5, 1.0, %v478_v28 }
  0x80   :  { %429 = vmatmul.msk.f32.gmra.mxu1 %vm136_vm2, %v426_v38 }
  0x86   :  { %v72_v34 = vpop.f32.mrf.mxu0 }
  0x87   :  { %v73_v35 = vadd.f32 %v441_v32, %v72_v34 }
  0x89   :  { %v423_v37 = vmul.f32 -1.442695, %v73_v35 }
  0x8b   :  { %445 = vpow2.f32 %v423_v37 }
  0x8e   :  { %v75_v39 = vpop.f32.mrf.mxu0 }
  0x8f   :  { %v76_v40 = vadd.f32 %v441_v32, %v75_v39 }
  0x91   :  { %v446_v41 = vpop.eup %445  ;;  %v424_v42 = vmul.f32 -1.442695, %v76_v40 }
  0x92   :  { %v84_v43 = vadd.f32 1.0, %v446_v41 }
  0x93   :  { %447 = vpow2.f32 %v424_v42 }
  0x94   :  { %449 = vrcp.f32 %v84_v43  ;;  %v97_v49 = vand.u32 2147483648, %v84_v43  ;;  %v95_v51 = vand.u32 2147483647, %v84_v43  ;;  %vm91_vm7 = vweird.f32 %v84_v43 }
  0x96   :  { %v98_v54 = vor.u32 1.1754944e-38, %v97_v49  ;;  %vm96_vm9 = vcmp.eq.f32.partialorder %v95_v51, 8.507059e+37  ;;  %v339_v51 = vld [vmem:[%s693_s9 + $0x10] sm:$0xff] }
  0x99   :  { %v448_v44 = vpop.eup %447 }
  0x9a   :  { %v450_v45 = vpop.eup %449  ;;  %v85_v46 = vadd.f32 1.0, %v448_v44 }
  0x9b   :  { %v87_v47 = vmul.f32 %v450_v45, %v84_v43  ;;  %vm92_vm6 = vweird.f32 %v450_v45 }
  0x9c   :  { %451 = vrcp.f32 %v85_v46  ;;  %vm93_vm8 = vmor %vm91_vm7, %vm92_vm6  ;;  %v112_v60 = vand.u32 2147483648, %v85_v46  ;;  %v110_v62 = vand.u32 2147483647, %v85_v46  ;;  %vm106_vm11 = vweird.f32 %v85_v46 }
  0x9d   :  { %v88_v48 = vsub.f32 1.0, %v87_v47 }
  0x9e   :  { %v113_v0 = vor.u32 1.1754944e-38, %v112_v60  ;;  %vm111_vm13 = vcmp.eq.f32.partialorder %v110_v62, 8.507059e+37 }
  0x9f   :  { %v89_v50 = vmul.f32 %v450_v45, %v88_v48 }
  0xa1   :  { %v90_v52 = vadd.f32 %v450_v45, %v89_v50  ;;  %v340_v50 = vld [vmem:[%s693_s9 + $0x18] sm:$0xff] }
  0xa2   :  { %v452_v53 = vpop.eup %451  ;;  %363 = vmatpush.msrb.mxu1 %v340_v50 }
  0xa3   :  { %v94_v55 = vsel %vm93_vm8, %v450_v45, %v90_v52  ;;  %v102_v56 = vmul.f32 %v452_v53, %v85_v46  ;;  %vm107_vm10 = vweird.f32 %v452_v53  ;;  %v443_v52 = vld [vmem:[%s690_s8] ss:$0 sm:$0xff] }
  0xa4   :  { %v99_v57 = vsel %vm96_vm9, %v98_v54, %v94_v55  ;;  %vm108_vm12 = vmor %vm106_vm11, %vm107_vm10  ;;  %364 = vmatpush.msrb.mxu1 %v339_v51  ;;  %v337_v54 = vld [vmem:[%s693_s9] sm:$0xff] }
  0xa5   :  { %v116_v58 = vmul.f32 %v99_v57, %v73_v35  ;;  %v103_v59 = vsub.f32 1.0, %v102_v56 }
  0xa7   :  { %202 = vmatmul.f32.vlgmr.msra.gmra.mxu2 %v116_v58  ;;  %v104_v61 = vmul.f32 %v452_v53, %v103_v59 }
  0xa9   :  { %v105_v63 = vadd.f32 %v452_v53, %v104_v61 }
  0xab   :  { %v109_v1 = vsel %vm108_vm12, %v452_v53, %v105_v63  ;;  %v338_v53 = vld [vmem:[%s693_s9 + $0x8] sm:$0xff] }
  0xac   :  { %v114_v2 = vsel %vm111_vm13, %v113_v0, %v109_v1  ;;  %365 = vmatpush.msrb.mxu1 %v338_v53 }
  0xad   :  { %v117_v3 = vmul.f32 %v114_v2, %v76_v40 }
  0xae   :  { %366 = vmatpush.msrb.mxu1 %v337_v54 }
  0xaf   :  { %205 = vmatmul.f32.gmra.mxu2 %v117_v3 }
  0xf5   :  { %v164_v11 = vpop.f32.mrf.mxu1 }
  0xfd   :  { %v167_v18 = vpop.f32.mrf.mxu1 }
 0x12a   :  { %v203_v14 = vpop.f32.mrf.mxu2 }
 0x12b   :  { %v204_v15 = vadd.f32 %v203_v14, %v164_v11 }
 0x12d   :  { %v213_v16 = vadd.f32 %v442_v12, %v204_v15 }
 0x12f   :  { %v430_v17 = vmul.f32 -1.442695, %v213_v16 }
 0x131   :  { %453 = vpow2.f32 %v430_v17 }
 0x132   :  { %v206_v19 = vpop.f32.mrf.mxu2 }
 0x133   :  { %v207_v20 = vadd.f32 %v206_v19, %v167_v18 }
 0x135   :  { %v214_v21 = vadd.f32 %v442_v12, %v207_v20 }
 0x137   :  { %v454_v22 = vpop.eup %453  ;;  %v431_v23 = vmul.f32 -1.442695, %v214_v21 }
 0x138   :  { %v221_v24 = vadd.f32 1.0, %v454_v22 }
 0x139   :  { %455 = vpow2.f32 %v431_v23  ;;  %v444_v23 = vld [vmem:[%s692_s10] ss:$0 sm:$0xff] }
 0x13a   :  { %457 = vrcp.f32 %v221_v24  ;;  %v234_v31 = vand.u32 2147483648, %v221_v24  ;;  %v232_v33 = vand.u32 2147483647, %v221_v24  ;;  %vm228_vm15 = vweird.f32 %v221_v24 }
 0x13c   :  { %v235_v36 = vor.u32 1.1754944e-38, %v234_v31  ;;  %vm233_vm2 = vcmp.eq.f32.partialorder %v232_v33, 8.507059e+37 }
 0x13f   :  { %v456_v25 = vpop.eup %455 }
 0x140   :  { %v458_v26 = vpop.eup %457  ;;  %v222_v27 = vadd.f32 1.0, %v456_v25 }
 0x141   :  { %v224_v28 = vmul.f32 %v458_v26, %v221_v24  ;;  %vm229_vm14 = vweird.f32 %v458_v26 }
 0x142   :  { %459 = vrcp.f32 %v222_v27  ;;  %vm230_vm1 = vmor %vm228_vm15, %vm229_vm14  ;;  %v249_v42 = vand.u32 2147483648, %v222_v27  ;;  %v247_v44 = vand.u32 2147483647, %v222_v27  ;;  %vm243_vm5 = vweird.f32 %v222_v27 }
 0x143   :  { %v225_v30 = vsub.f32 1.0, %v224_v28 }
 0x144   :  { %v250_v46 = vor.u32 1.1754944e-38, %v249_v42  ;;  %vm248_vm7 = vcmp.eq.f32.partialorder %v247_v44, 8.507059e+37 }
 0x145   :  { %v226_v32 = vmul.f32 %v458_v26, %v225_v30 }
 0x147   :  { %v227_v34 = vadd.f32 %v458_v26, %v226_v32 }
 0x148   :  { %v460_v35 = vpop.eup %459 }
 0x149   :  { %v231_v37 = vsel %vm230_vm1, %v458_v26, %v227_v34  ;;  %v239_v38 = vmul.f32 %v460_v35, %v222_v27  ;;  %vm244_vm4 = vweird.f32 %v460_v35 }
 0x14a   :  { %v236_v39 = vsel %vm233_vm2, %v235_v36, %v231_v37  ;;  %vm245_vm6 = vmor %vm243_vm5, %vm244_vm4  ;;  %vm414_vm2 = vcmask 15360  }
 0x14b   :  { %v253_v40 = vmul.f32 %v236_v39, %v213_v16  ;;  %v240_v41 = vsub.f32 1.0, %v239_v38 }
 0x14d   :  { %432 = vmatmul.msk.f32.vlgmr.msra.gmra.mxu3 %vm267_vm3, %v253_v40  ;;  %v241_v43 = vmul.f32 %v460_v35, %v240_v41 }
 0x14f   :  { %v242_v45 = vadd.f32 %v460_v35, %v241_v43 }
 0x151   :  { %v246_v47 = vsel %vm245_vm6, %v460_v35, %v242_v45 }
 0x152   :  { %v251_v48 = vsel %vm248_vm7, %v250_v46, %v246_v47 }
 0x153   :  { %v254_v49 = vmul.f32 %v251_v48, %v214_v21 }
 0x155   :  { %433 = vmatmul.msk.f32.gmra.mxu3 %vm267_vm3, %v254_v49 }
 0x1d0   :  { %v291_v55 = vpop.f32.mrf.mxu3 }
 0x1d1   :  { %v292_v56 = vadd.f32 %v443_v52, %v291_v55 }
 0x1d3   :  { %v434_v57 = vmul.f32 -1.442695, %v292_v56 }
 0x1d5   :  { %461 = vpow2.f32 %v434_v57 }
 0x1d8   :  { %v294_v58 = vpop.f32.mrf.mxu3 }
 0x1d9   :  { %v295_v59 = vadd.f32 %v443_v52, %v294_v58 }
 0x1db   :  { %v462_v60 = vpop.eup %461  ;;  %v435_v61 = vmul.f32 -1.442695, %v295_v59 }
 0x1dc   :  { %v303_v62 = vadd.f32 1.0, %v462_v60 }
 0x1dd   :  { %463 = vpow2.f32 %v435_v61 }
 0x1de   :  { %465 = vrcp.f32 %v303_v62  ;;  %v316_v4 = vand.u32 2147483648, %v303_v62  ;;  %v314_v6 = vand.u32 2147483647, %v303_v62  ;;  %vm310_vm9 = vweird.f32 %v303_v62 }
 0x1e0   :  { %v317_v9 = vor.u32 1.1754944e-38, %v316_v4  ;;  %vm315_vm11 = vcmp.eq.f32.partialorder %v314_v6, 8.507059e+37 }
 0x1e3   :  { %v464_v63 = vpop.eup %463 }
 0x1e4   :  { %v466_v0 = vpop.eup %465  ;;  %v304_v1 = vadd.f32 1.0, %v464_v63 }
 0x1e5   :  { %v306_v2 = vmul.f32 %v466_v0, %v303_v62  ;;  %vm311_vm8 = vweird.f32 %v466_v0 }
 0x1e6   :  { %467 = vrcp.f32 %v304_v1  ;;  %vm312_vm10 = vmor %vm310_vm9, %vm311_vm8  ;;  %v331_v15 = vand.u32 2147483648, %v304_v1  ;;  %v329_v17 = vand.u32 2147483647, %v304_v1  ;;  %vm325_vm13 = vweird.f32 %v304_v1 }
 0x1e7   :  { %v307_v3 = vsub.f32 1.0, %v306_v2 }
 0x1e8   :  { %v332_v19 = vor.u32 1.1754944e-38, %v331_v15  ;;  %vm330_vm15 = vcmp.eq.f32.partialorder %v329_v17, 8.507059e+37 }
 0x1e9   :  { %v308_v5 = vmul.f32 %v466_v0, %v307_v3 }
 0x1eb   :  { %v309_v7 = vadd.f32 %v466_v0, %v308_v5 }
 0x1ec   :  { %v468_v8 = vpop.eup %467 }
 0x1ed   :  { %v313_v10 = vsel %vm312_vm10, %v466_v0, %v309_v7  ;;  %v321_v11 = vmul.f32 %v468_v8, %v304_v1  ;;  %vm326_vm12 = vweird.f32 %v468_v8 }
 0x1ee   :  { %v318_v12 = vsel %vm315_vm11, %v317_v9, %v313_v10  ;;  %vm327_vm14 = vmor %vm325_vm13, %vm326_vm12 }
 0x1ef   :  { %v335_v13 = vmul.f32 %v318_v12, %v292_v56  ;;  %v322_v14 = vsub.f32 1.0, %v321_v11 }
 0x1f1   :  { %v323_v16 = vmul.f32 %v468_v8, %v322_v14  ;;  %436 = vmatmul.msk.f32.vlgmr.msrb.gmra.mxu1 %vm48_vm0, %v335_v13 }
 0x1f3   :  { %v324_v18 = vadd.f32 %v468_v8, %v323_v16 }
 0x1f5   :  { %v328_v20 = vsel %vm327_vm14, %v468_v8, %v324_v18 }
 0x1f6   :  { %v333_v21 = vsel %vm330_vm15, %v332_v19, %v328_v20 }
 0x1f7   :  { %v336_v22 = vmul.f32 %v333_v21, %v295_v59 }
 0x1f9   :  { %437 = vmatmul.msk.f32.gmra.mxu1 %vm48_vm0, %v336_v22 }
 0x26e   :  { %v368_v24 = vpop.f32.mrf.mxu1 }
 0x26f   :  { %v369_v25 = vadd.f32 %v444_v23, %v368_v24 }
 0x271   :  { %v380_v26 = vand.u32 2147483647, %v369_v25  ;;  %v374_v46 = vmax.f32 %v369_v25, 0.0  ;;  %vm376_vm1 = vcmp.ne.f32.partialorder %v369_v25, %v369_v25 }
 0x273   :  { %v382_v27 = vsub.f32 0.0, %v380_v26 }
 0x275   :  { %v384_v28 = vmul.f32 1.442695, %v382_v27 }
 0x276   :  { %v371_v30 = vpop.f32.mrf.mxu1 }
 0x277   :  { %469 = vpow2.f32 %v384_v28  ;;  %v372_v31 = vadd.f32 %v444_v23, %v371_v30 }
 0x279   :  { %v381_v32 = vand.u32 2147483647, %v372_v31  ;;  %v375_v56 = vmax.f32 %v372_v31, 0.0  ;;  %vm377_vm4 = vcmp.ne.f32.partialorder %v372_v31, %v372_v31 }
 0x27b   :  { %v383_v33 = vsub.f32 0.0, %v381_v32 }
 0x27d   :  { %v470_v34 = vpop.eup %469  ;;  %v386_v35 = vmul.f32 1.442695, %v383_v33 }
 0x27e   :  { %v388_v36 = vadd.f32 1.0, %v470_v34  ;;  %v391_v37 = vmul.f32 -0.5, %v470_v34  ;;  %v394_v39 = vand.u32 2147483647, %v470_v34 }
 0x27f   :  { %471 = vpow2.f32 %v386_v35 }
 0x280   :  { %473 = vlog2.f32 %v388_v36  ;;  %v392_v38 = vadd.f32 1.0, %v391_v37  ;;  %vm395_vm0 = vcmp.lt.f32.partialorder %v394_v39, 0.0004427343 }
 0x282   :  { %v393_v44 = vmul.f32 %v470_v34, %v392_v38 }
 0x285   :  { %v472_v40 = vpop.eup %471 }
 0x286   :  { %v474_v41 = vpop.eup %473  ;;  %v397_v42 = vadd.f32 1.0, %v472_v40  ;;  %v400_v45 = vmul.f32 -0.5, %v472_v40  ;;  %v403_v51 = vand.u32 2147483647, %v472_v40 }
 0x287   :  { %v390_v43 = vmul.f32 0.6931472, %v474_v41 }
 0x288   :  { %475 = vlog2.f32 %v397_v42  ;;  %v401_v49 = vadd.f32 1.0, %v400_v45  ;;  %vm404_vm3 = vcmp.lt.f32.partialorder %v403_v51, 0.0004427343 }
 0x289   :  { %v396_v47 = vsel %vm395_vm0, %v393_v44, %v390_v43 }
 0x28a   :  { %v406_v48 = vadd.f32 %v396_v47, %v374_v46  ;;  %v402_v55 = vmul.f32 %v472_v40, %v401_v49 }
 0x28c   :  { %v408_v50 = vsel %vm376_vm1, %v369_v25, %v406_v48 }
 0x28d   :  { %v412_v52 = vadd.f32 %v613_v29, %v408_v50 }
 0x28e   :  { %v476_v53 = vpop.eup %475 }
 0x28f   :  { %415 = vst.msk [vmem:[%s694_s11] sm:$0xff] %vm414_vm2, %v412_v52  ;;  %v399_v54 = vmul.f32 0.6931472, %v476_v53 }
 0x291   :  { %v405_v57 = vsel %vm404_vm3, %v402_v55, %v399_v54 }
 0x292   :  { %v407_v58 = vadd.f32 %v405_v57, %v375_v56 }
 0x294   :  { %v409_v59 = vsel %vm377_vm4, %v372_v31, %v407_v58 }
 0x295   :  { %v413_v60 = vadd.f32 %v613_v29, %v409_v59 }
 0x297   :  { %416 = vst.msk [vmem:[%s694_s11 + $0x8] sm:$0xff] %vm414_vm2, %v413_v60 }

</bundles_post_ra>
